<compile_context>
chip_gen: v7x
topology: tpu7x:2x2x1
jax: 0.10.0
libtpu: 0.0.40
codegen_flags: <defaults>
</compile_context>

<pallas_src>
import numpy as np

import jax
import jax.numpy as jnp
from jax.experimental import pallas as pl
from jax.experimental.pallas import tpu as pltpu

_LANE = 128
_MAX_EPS = 8          # bound the static member unroll (live-range / spill safety)


def _round_up(n, m):
    return ((n + m - 1) // m) * m


def _cdiv(a, b):
    return (a + b - 1) // b


def _apply_activation(h, activation):
    if activation == "swish":
        return h * jax.nn.sigmoid(h)            # SiLU
    if activation == "relu":
        return jnp.maximum(h, 0.0)
    if activation == "lrelu":
        return jnp.where(h > 0.0, h, 0.01 * h)  # nn.LeakyReLU() default slope
    if activation in (None, "identity"):
        return h
    raise ValueError(f"unknown activation: {activation!r}")


def _vmem_budget():
    """(working-set budget, physical cap) ~ half of per-core VMEM."""
    try:
        cap = int(pltpu.get_tpu_info().vmem_capacity_bytes)
    except Exception:
        cap = 64 << 20                          # conservative (v7x per-TC) fallback
    return cap // 2, cap


def _make_kernel(eps, activation):
    def kernel(x_ref, w_ref, b_ref, o_ref):
        # x_ref: (eps, bt, in_p), w_ref: (eps, in_p, out_p),
        # b_ref: (eps, 1, out_p), o_ref: (eps, bt, out_p)
        # eps is VMEM-budgeted and capped, so a static unroll stays small.
        for m in range(eps):
            h = jnp.dot(x_ref[m], w_ref[m], preferred_element_type=jnp.float32)
            h = h + b_ref[m]                    # (1, out_p) broadcast over rows
            h = _apply_activation(h, activation)
            o_ref[m] = h.astype(o_ref.dtype)

    return kernel


def prepare_lin_layer(lin_w, lin_b, *, compute_dtype=jnp.float32,
                      vmem_budget_bytes=None):
    """One-time pad/cast of the ensemble weights (hoists the per-call HBM pass).

    Returns (w_padded, b_padded, meta).  Do this at init / once per model, then
    call lin_layer_apply(x, w_padded, b_padded, meta) in the hot path.
    """
    ens, in_f, out_f = lin_w.shape
    assert lin_b.shape == (ens, 1, out_f)

    c_itemsize = jnp.dtype(compute_dtype).itemsize
    row_mult = 16 if c_itemsize == 2 else 8     # full sublane packing (bf16 packs 2 rows)

    # K only to sublane packing; N to 128 lanes for unmasked, lane-dense stores.
    in_p = _round_up(in_f, row_mult)
    out_p = _round_up(out_f, _LANE)

    if vmem_budget_bytes is None:
        budget, cap = _vmem_budget()
    else:
        budget = int(vmem_budget_bytes)
        cap = max(2 * budget, 64 << 20)

    # Members per grid step: target 2 ensemble grid steps (one per TensorCore on
    # v7x), shrunk so double-buffered weight tiles stay within half the budget.
    w_bytes_per_m = in_p * out_p * c_itemsize + out_p * 4
    eps = 1 if ens <= 1 else _cdiv(ens, 2)
    eps = min(eps, _MAX_EPS)
    while eps > 1 and 2 * eps * w_bytes_per_m > budget // 2:
        eps -= 1
    ens_p = _round_up(ens, eps)                 # odd ensembles: pad with zero members

    w_p = jnp.pad(lin_w, ((0, ens_p - ens), (0, in_p - in_f), (0, out_p - out_f)))
    b_p = jnp.pad(lin_b, ((0, ens_p - ens), (0, 0), (0, out_p - out_f)))
    w_p = w_p.astype(compute_dtype)
    b_p = b_p.astype(jnp.float32)               # bias add + activation stay f32

    meta = dict(ens=ens, in_f=in_f, out_f=out_f, in_p=in_p, out_p=out_p,
                ens_p=ens_p, eps=eps, row_mult=row_mult,
                compute_dtype=jnp.dtype(compute_dtype), c_itemsize=c_itemsize,
                budget=budget, cap=cap, w_bytes_per_m=w_bytes_per_m)
    return w_p, b_p, meta


def lin_layer_apply(x, w_p, b_p, meta, *, activation="swish"):
    """Apply the (pre-padded, pre-cast) LinLayer to x: (ens, batch, in_f) -> (ens, batch, out_f)."""
    ens, batch, in_f = x.shape
    assert ens == meta["ens"] and in_f == meta["in_f"]

    in_p, out_p = meta["in_p"], meta["out_p"]
    ens_p, eps = meta["ens_p"], meta["eps"]
    row_mult = meta["row_mult"]
    c_dtype, c_itemsize = meta["compute_dtype"], meta["c_itemsize"]
    budget, cap = meta["budget"], meta["cap"]
    out_f = meta["out_f"]
    grid_e = ens_p // eps

    # ---- batch tile from the remaining VMEM budget (weights stay resident) ----
    w_step = 2 * eps * meta["w_bytes_per_m"]            # double-buffered W + b
    per_row = eps * (in_p * c_itemsize                   # x row (compute dtype)
                     + out_p * 4                         # f32 out row
                     + 2 * out_p * 4)                    # h + sigmoid intermediates
    avail = max(0, budget - w_step)
    bt_cap = max(row_mult, avail // max(1, 2 * per_row))
    target = 1024 if c_itemsize == 2 else 512            # measured sweet spot
    batch_tile = min(target, bt_cap, _round_up(batch, row_mult))
    batch_tile = max(row_mult, (batch_tile // row_mult) * row_mult)

    batch_p = _round_up(batch, batch_tile)
    n_bt = batch_p // batch_tile

    # Zero padding is exact: affine map of 0 is 0 (bias pad is 0) and every
    # supported activation maps 0 -> 0; padding is sliced off below.
    x_p = jnp.pad(x, ((0, ens_p - ens), (0, batch_p - batch), (0, in_p - in_f)))
    x_p = x_p.astype(c_dtype)

    step_bytes = w_step + 2 * batch_tile * per_row
    vmem_limit = int(min(int(0.75 * cap), max(step_bytes + (8 << 20), 32 << 20)))

    kernel = _make_kernel(eps, activation)

    out_padded = pl.pallas_call(
        kernel,
        # Batch innermost: the W/b block index does not change across batch
        # steps, so their tiles are fetched once per ensemble group.
        grid=(grid_e, n_bt),
        in_specs=[
            pl.BlockSpec((eps, batch_tile, in_p), lambda e, bi: (e, bi, 0)),
            pl.BlockSpec((eps, in_p, out_p), lambda e, bi: (e, 0, 0)),
            pl.BlockSpec((eps, 1, out_p), lambda e, bi: (e, 0, 0)),
        ],
        out_specs=pl.BlockSpec((eps, batch_tile, out_p), lambda e, bi: (e, bi, 0)),
        out_shape=jax.ShapeDtypeStruct((ens_p, batch_p, out_p), jnp.float32),
        compiler_params=pltpu.CompilerParams(
            # TODO(synk): if an xprof trace shows one v7x TensorCore idle with
            # only 2 "parallel" ensemble steps, switch to an explicit 2-way
            # CORE_PARALLEL leading axis / pl.core_map split.
            dimension_semantics=("parallel", "arbitrary"),
            vmem_limit_bytes=vmem_limit,
        ),
    )(x_p, w_p, b_p)

    # TODO(synk): when stacking LinLayers, keep the padded (batch_p, out_p)
    # activations (and optionally bf16 outputs) between layers so this slice
    # happens once at the end of the network, not per layer.
    return out_padded[:ens, :batch, :out_f]


def lin_layer_forward(x, lin_w, lin_b, *, activation="swish",
                      compute_dtype=jnp.float32, vmem_budget_bytes=None):
    """Convenience wrapper: prepare (pad/cast W once) + apply.

    compute_dtype=jnp.bfloat16 halves x/W HBM bytes (recommended on v5e/v6e/v7x
    for this memory-bound kernel); accumulation, bias and activation stay f32.
    This is a deliberate precision trade-off vs. the f32 PyTorch reference.
    """
    w_p, b_p, meta = prepare_lin_layer(lin_w, lin_b, compute_dtype=compute_dtype,
                                       vmem_budget_bytes=vmem_budget_bytes)
    return lin_layer_apply(x, w_p, b_p, meta, activation=activation)


def init_lin_layer(key, ens_size, in_f, out_f):
    """Mirror get_affine_params: truncated-normal weights, zero bias."""
    std = 1.0 / (2.0 * np.sqrt(in_f))
    w = std * jax.random.truncated_normal(
        key, -2.0, 2.0, (ens_size, in_f, out_f), dtype=jnp.float32)
    b = jnp.zeros((ens_size, 1, out_f), dtype=jnp.float32)
    return w, b


def reference_forward(x, lin_w, lin_b, activation="swish"):
    """Pure-JAX reference reproducing LinLayer.forward."""
    h = jnp.einsum("ebi,eio->ebo", x, lin_w) + lin_b
    return _apply_activation(h, activation)


if __name__ == "__main__":
    # Small, PETS-like shapes: odd ensemble exercises the zero-member padding,
    # batch exercises row padding, out_f exercises the 128-lane padding.
    ens_size, batch, in_f, out_f = 5, 10, 16, 32

    key = jax.random.PRNGKey(0)
    k_w, k_x = jax.random.split(key)
    lin_w, lin_b = init_lin_layer(k_w, ens_size, in_f, out_f)
    x = jax.random.normal(k_x, (ens_size, batch, in_f), dtype=jnp.float32)

    y_ref = np.asarray(jax.block_until_ready(
        reference_forward(x, lin_w, lin_b, activation="swish")))

    # f32-operand path (tolerance allows for MXU default-precision passes on f32).
    y = lin_layer_forward(x, lin_w, lin_b, activation="swish",
                          compute_dtype=jnp.float32)
    y = np.asarray(jax.block_until_ready(y))
    assert y.shape == (ens_size, batch, out_f)
    np.testing.assert_allclose(y, y_ref, rtol=2e-2, atol=2e-2)

    # bf16-operand path via the hoisted prepare/apply API (hot-path form).
    w_p, b_p, meta = prepare_lin_layer(lin_w, lin_b, compute_dtype=jnp.bfloat16)
    y_bf16 = np.asarray(jax.block_until_ready(
        lin_layer_apply(x, w_p, b_p, meta, activation="swish")))
    np.testing.assert_allclose(y_bf16, y_ref, rtol=1.5e-1, atol=1.5e-1)

    print("KERNEL_OK")
</pallas_src>

<mosaic_0001>
module attributes {stable_mosaic.version = 11 : i64} {
  func.func @kernel(%arg0: i32, %arg1: i32, %arg2: memref<3x16x16xf32, #tpu.memory_space<vmem>>, %arg3: memref<3x16x128xf32, #tpu.memory_space<vmem>>, %arg4: memref<3x1x128xf32, #tpu.memory_space<vmem>>, %arg5: memref<3x16x128xf32, #tpu.memory_space<vmem>>) attributes {dimension_semantics = [#tpu.dimension_semantics<parallel>, #tpu.dimension_semantics<arbitrary>], iteration_bounds = array<i64: 2, 1>, scalar_prefetch = 0 : i64, scratch_operands = 0 : i64, tpu.core_type = #tpu.core_type<tc>, window_params = [{transform_indices = @transform_0, window_bounds = array<i64: 3, 16, 16>}, {transform_indices = @transform_1, window_bounds = array<i64: 3, 16, 128>}, {transform_indices = @transform_2, window_bounds = array<i64: 3, 1, 128>}, {transform_indices = @transform_3, window_bounds = array<i64: 3, 16, 128>}]} {
    %c0 = arith.constant 0 : index
    %c0_0 = arith.constant 0 : index
    %c0_1 = arith.constant 0 : index
    %0 = vector.load %arg2[%c0, %c0_0, %c0_1] : memref<3x16x16xf32, #tpu.memory_space<vmem>>, vector<1x16x16xf32>
    %1 = vector.shape_cast %0 : vector<1x16x16xf32> to vector<16x16xf32>
    %c0_2 = arith.constant 0 : index
    %c0_3 = arith.constant 0 : index
    %c0_4 = arith.constant 0 : index
    %2 = vector.load %arg3[%c0_2, %c0_3, %c0_4] : memref<3x16x128xf32, #tpu.memory_space<vmem>>, vector<1x16x128xf32>
    %3 = vector.shape_cast %2 : vector<1x16x128xf32> to vector<16x128xf32>
    %cst = arith.constant dense<0.000000e+00> : vector<16x128xf32>
    %4 = tpu.matmul %1, %3, %cst {dimension_numbers = #tpu.dot_dimension_numbers<[1], [0], [0], [1], [0, 0, 1, 1], [], []>} : vector<16x16xf32>, vector<16x128xf32>, vector<16x128xf32> -> vector<16x128xf32>
    %c0_5 = arith.constant 0 : index
    %c0_6 = arith.constant 0 : index
    %c0_7 = arith.constant 0 : index
    %5 = vector.load %arg4[%c0_5, %c0_6, %c0_7] : memref<3x1x128xf32, #tpu.memory_space<vmem>>, vector<1x1x128xf32>
    %6 = vector.shape_cast %5 : vector<1x1x128xf32> to vector<1x128xf32>
    %7 = vector.broadcast %6 : vector<1x128xf32> to vector<16x128xf32>
    %8 = arith.addf %4, %7 : vector<16x128xf32>
    %9 = arith.negf %8 : vector<16x128xf32>
    %10 = math.exp %9 : vector<16x128xf32>
    %cst_8 = arith.constant 1.000000e+00 : f32
    %11 = vector.broadcast %cst_8 : f32 to vector<16x128xf32>
    %12 = arith.addf %11, %10 : vector<16x128xf32>
    %13 = arith.divf %11, %12 : vector<16x128xf32>
    %14 = arith.mulf %8, %13 : vector<16x128xf32>
    %c0_9 = arith.constant 0 : index
    %c0_10 = arith.constant 0 : index
    %c0_11 = arith.constant 0 : index
    %15 = vector.load %arg5[%c0_9, %c0_10, %c0_11] : memref<3x16x128xf32, #tpu.memory_space<vmem>>, vector<1x16x128xf32>
    %16 = vector.shape_cast %15 : vector<1x16x128xf32> to vector<16x128xf32>
    %17 = vector.shape_cast %14 : vector<16x128xf32> to vector<1x16x128xf32>
    tpu.vector_store %arg5[%c0_9, %c0_10, %c0_11], %17 {strides = array<i32>} : memref<3x16x128xf32, #tpu.memory_space<vmem>>, vector<1x16x128xf32>,
    %c1 = arith.constant 1 : index
    %c0_12 = arith.constant 0 : index
    %c0_13 = arith.constant 0 : index
    %18 = vector.load %arg2[%c1, %c0_12, %c0_13] : memref<3x16x16xf32, #tpu.memory_space<vmem>>, vector<1x16x16xf32>
    %19 = vector.shape_cast %18 : vector<1x16x16xf32> to vector<16x16xf32>
    %c1_14 = arith.constant 1 : index
    %c0_15 = arith.constant 0 : index
    %c0_16 = arith.constant 0 : index
    %20 = vector.load %arg3[%c1_14, %c0_15, %c0_16] : memref<3x16x128xf32, #tpu.memory_space<vmem>>, vector<1x16x128xf32>
    %21 = vector.shape_cast %20 : vector<1x16x128xf32> to vector<16x128xf32>
    %cst_17 = arith.constant dense<0.000000e+00> : vector<16x128xf32>
    %22 = tpu.matmul %19, %21, %cst_17 {dimension_numbers = #tpu.dot_dimension_numbers<[1], [0], [0], [1], [0, 0, 1, 1], [], []>} : vector<16x16xf32>, vector<16x128xf32>, vector<16x128xf32> -> vector<16x128xf32>
    %c1_18 = arith.constant 1 : index
    %c0_19 = arith.constant 0 : index
    %c0_20 = arith.constant 0 : index
    %23 = vector.load %arg4[%c1_18, %c0_19, %c0_20] : memref<3x1x128xf32, #tpu.memory_space<vmem>>, vector<1x1x128xf32>
    %24 = vector.shape_cast %23 : vector<1x1x128xf32> to vector<1x128xf32>
    %25 = vector.broadcast %24 : vector<1x128xf32> to vector<16x128xf32>
    %26 = arith.addf %22, %25 : vector<16x128xf32>
    %27 = arith.negf %26 : vector<16x128xf32>
    %28 = math.exp %27 : vector<16x128xf32>
    %cst_21 = arith.constant 1.000000e+00 : f32
    %29 = vector.broadcast %cst_21 : f32 to vector<16x128xf32>
    %30 = arith.addf %29, %28 : vector<16x128xf32>
    %31 = arith.divf %29, %30 : vector<16x128xf32>
    %32 = arith.mulf %26, %31 : vector<16x128xf32>
    %c1_22 = arith.constant 1 : index
    %c0_23 = arith.constant 0 : index
    %c0_24 = arith.constant 0 : index
    %33 = vector.load %arg5[%c1_22, %c0_23, %c0_24] : memref<3x16x128xf32, #tpu.memory_space<vmem>>, vector<1x16x128xf32>
    %34 = vector.shape_cast %33 : vector<1x16x128xf32> to vector<16x128xf32>
    %35 = vector.shape_cast %32 : vector<16x128xf32> to vector<1x16x128xf32>
    tpu.vector_store %arg5[%c1_22, %c0_23, %c0_24], %35 {strides = array<i32>} : memref<3x16x128xf32, #tpu.memory_space<vmem>>, vector<1x16x128xf32>,
    %c2 = arith.constant 2 : index
    %c0_25 = arith.constant 0 : index
    %c0_26 = arith.constant 0 : index
    %36 = vector.load %arg2[%c2, %c0_25, %c0_26] : memref<3x16x16xf32, #tpu.memory_space<vmem>>, vector<1x16x16xf32>
    %37 = vector.shape_cast %36 : vector<1x16x16xf32> to vector<16x16xf32>
    %c2_27 = arith.constant 2 : index
    %c0_28 = arith.constant 0 : index
    %c0_29 = arith.constant 0 : index
    %38 = vector.load %arg3[%c2_27, %c0_28, %c0_29] : memref<3x16x128xf32, #tpu.memory_space<vmem>>, vector<1x16x128xf32>
    %39 = vector.shape_cast %38 : vector<1x16x128xf32> to vector<16x128xf32>
    %cst_30 = arith.constant dense<0.000000e+00> : vector<16x128xf32>
    %40 = tpu.matmul %37, %39, %cst_30 {dimension_numbers = #tpu.dot_dimension_numbers<[1], [0], [0], [1], [0, 0, 1, 1], [], []>} : vector<16x16xf32>, vector<16x128xf32>, vector<16x128xf32> -> vector<16x128xf32>
    %c2_31 = arith.constant 2 : index
    %c0_32 = arith.constant 0 : index
    %c0_33 = arith.constant 0 : index
    %41 = vector.load %arg4[%c2_31, %c0_32, %c0_33] : memref<3x1x128xf32, #tpu.memory_space<vmem>>, vector<1x1x128xf32>
    %42 = vector.shape_cast %41 : vector<1x1x128xf32> to vector<1x128xf32>
    %43 = vector.broadcast %42 : vector<1x128xf32> to vector<16x128xf32>
    %44 = arith.addf %40, %43 : vector<16x128xf32>
    %45 = arith.negf %44 : vector<16x128xf32>
    %46 = math.exp %45 : vector<16x128xf32>
    %cst_34 = arith.constant 1.000000e+00 : f32
    %47 = vector.broadcast %cst_34 : f32 to vector<16x128xf32>
    %48 = arith.addf %47, %46 : vector<16x128xf32>
    %49 = arith.divf %47, %48 : vector<16x128xf32>
    %50 = arith.mulf %44, %49 : vector<16x128xf32>
    %c2_35 = arith.constant 2 : index
    %c0_36 = arith.constant 0 : index
    %c0_37 = arith.constant 0 : index
    %51 = vector.load %arg5[%c2_35, %c0_36, %c0_37] : memref<3x16x128xf32, #tpu.memory_space<vmem>>, vector<1x16x128xf32>
    %52 = vector.shape_cast %51 : vector<1x16x128xf32> to vector<16x128xf32>
    %53 = vector.shape_cast %50 : vector<16x128xf32> to vector<1x16x128xf32>
    tpu.vector_store %arg5[%c2_35, %c0_36, %c0_37], %53 {strides = array<i32>} : memref<3x16x128xf32, #tpu.memory_space<vmem>>, vector<1x16x128xf32>,
    return
  }
  func.func @transform_0(%arg0: i32, %arg1: i32) -> (i32, i32, i32) {
    %c0_i32 = arith.constant 0 : i32
    %c0_i32_0 = arith.constant 0 : i32
    return %arg0, %arg1, %c0_i32 : i32, i32, i32
  }
  func.func @transform_1(%arg0: i32, %arg1: i32) -> (i32, i32, i32) {
    %c0_i32 = arith.constant 0 : i32
    %c0_i32_0 = arith.constant 0 : i32
    %c0_i32_1 = arith.constant 0 : i32
    return %arg0, %c0_i32, %c0_i32_0 : i32, i32, i32
  }
  func.func @transform_2(%arg0: i32, %arg1: i32) -> (i32, i32, i32) {
    %c0_i32 = arith.constant 0 : i32
    %c0_i32_0 = arith.constant 0 : i32
    %c0_i32_1 = arith.constant 0 : i32
    return %arg0, %c0_i32, %c0_i32_0 : i32, i32, i32
  }
  func.func @transform_3(%arg0: i32, %arg1: i32) -> (i32, i32, i32) {
    %c0_i32 = arith.constant 0 : i32
    %c0_i32_0 = arith.constant 0 : i32
    return %arg0, %arg1, %c0_i32 : i32, i32, i32
  }
}

</mosaic_0001>

<bundles_post_ra>
// kernel: tpu_custom_call.1
= control target key start
LH: loop header
LB: loop body
LE: loop exit
PB: predicated region body
PF: predicated region fallthrough
CT: control target
= control target key end

     0   :  { %8 = vsyncpa [#allocation3], 0  ;;  %s1370_s0 = inlined_call_operand.hbm [shape: f32[6,16,16], index: 0, kind: input, shape index: {}]   ;;  %s1371_s1 = inlined_call_operand.hbm [shape: f32[6,16,128], index: 1, kind: input, shape index: {}]   ;;  %s1372_s2 = inlined_call_operand.vmem [shape: f32[6,1,128], index: 2, kind: input, shape index: {}]   ;;  %s1373_s3 = inlined_call_operand.hbm [shape: f32[6,16,128], index: 3, kind: output, shape index: {}]  }
   0x1   :  { %10 = vsyncpa [#allocation3 + $0x1], 0 }
   0x2   :  { %11 = vsyncpa [#allocation6], 0 }
   0x3   :  { %13 = vsyncpa [#allocation6 + $0x1], 0 }
   0x4   :  { %14 = vsyncpa [#allocation4], 0 }
   0x5   :  { %16 = vsyncpa [#allocation4 + $0x1], 0  ;;  %s1111_s12 = smov 0   ;;  %s1113_s13 = smov 0  }
   0x6   :  { %s1115_s14 = smov 0   ;;  %s1117_s15 = smov 0  }
   0x7   :  { %s1119_s16 = smov 0   ;;  %s1121_s17 = smov 0  }
   0x8 LB: > { %s742_s18 = sadd.s32 4294967295, %s1082_s17   ;;  %s743_s19 = sadd.s32 4294967294, %s1082_s17   ;;  %s1082_s17 = sphi %s1121_s17, %s22_s17   ;;  %s1078_s16 = sphi %s1119_s16, %s1391_s16   ;;  %s1074_s15 = sphi %s1117_s15, %s1390_s15   ;;  %s1070_s14 = sphi %s1115_s14, %s1389_s14   ;;  %s1066_s13 = sphi %s1113_s13, %s1388_s13   ;;  %s1062_s12 = sphi %s1111_s12, %s1387_s12  }
   0x9   : > { %s34_s20 = sadd.s32 1, %s1078_s16  ;;  %s43_s21 = sadd.s32 1, %s1070_s14 }
   0xa   : > { %p36_p0 = scmp.ge.s32.totalorder %s34_s20, 2  ;;  %p50_p1 = scmp.ne.s32.totalorder %s1070_s14, %s1066_s13 }
   0xb   : > { %p51_p2 = scmp.eq.s32.totalorder %s1082_s17, 0  ;;  %p56_p3 = scmp.ne.s32.totalorder %s1066_s13, %s1062_s12 }
   0xc   : > { %s1393_s20 = smov (%p36_p0, %s34_s20), 0  ;;  %p57_p5 = scmp.eq.s32.totalorder %s742_s18, 0 }
   0xd   : > { %p1152_p4 = por %p51_p2, %p50_p1  ;;  %s38_s23 = ssub.s32 %s1078_s16, %s1393_s20 }
   0xe   : > { %p134_p6 = scmp.eq.s32.totalorder %s742_s18, 1  ;;  %p41_p7 = scmp.eq.s32.totalorder %s38_s23, 0 }
   0xf   : > { %p1158_p8 = por %p57_p5, %p56_p3  ;;  %p140_p10 = scmp.eq.s32.totalorder %s743_s19, 1 }
  0x10   : > { %p1162_p9 = por %p134_p6, %p50_p1  ;;  %p858_p13 = scmp.lt.s32.totalorder %s1082_s17, 2 }
  0x11   : > { %s1377_s24 = scalar_select %p1158_p8, 1, 0 }
  0x12   : > { %s1378_s25 = scalar_select %p1162_p9, 1, 0 }
  0x13   : > { %s1167_s26 = scalar_select %p41_p7, %s1070_s14, %s43_s21  }
  0x14   : > { %p1169_p11 = por %p140_p10, %p56_p3  ;;  %s1176_s28 = sand.u32 1, %s1070_s14  }
  0x15   : > { %s838_s29 = smul.u32 48, %s1176_s28  ;;  %p1182_p0 = pnand %p858_p13, %p1152_p4 }
  0x16   : > { %s1379_s27 = scalar_select %p1169_p11, 1, 0 }
  0x17   : > { %s790_s30 = smul.u32 768, %s1078_s16  ;;  %s164_s8 = scalar_lea.vmem [#allocation2], %s838_s29 }
  0x18   : > { %s174_s9 = sshll.u32 %s164_s8, 4  ;;  %s161_s10 = scalar_lea.sflag [#allocation3], %s1176_s28  ;;  %s1195_s9 = int_to_ptr.vmem [resolvable:$true] %s174_s9 }
  0x19   : > { %s1191_s7 = scalar_lea.hbm %s1370_s0, %s790_s30  ;;  %p938_p3 = pneg %p1182_p0 }
  0x1a   : > { %s936_s11 = scalar_lea.hbm %s1191_s7, 768  ;;  %s941_s21 = scalar_lea.hbm %s1370_s0, 1536 }
  0x1b   : > { %p937_p2 = scmp.ne.s32.totalorder %s1191_s7, %s936_s11  ;;  %p942_p6 = scmp.lt.u32.totalorder %s1191_s7, %s1370_s0 }
  0x1c   : > { %p943_p7 = scmp.lt.u32.totalorder %s941_s21, %s936_s11  ;;  %p945_p13 = scmp.lt.u32.totalorder %s936_s11, %s1191_s7 }
  0x1d   : > { %p939_p4 = pnand %p938_p3, %p937_p2 }
  0x1e   : > { %p944_p10 = por %p943_p7, %p942_p6 }
  0x1f   : > { %p940_p5 = pneg %p939_p4 }
  0x20   : > { %p946_p12 = por %p945_p13, %p944_p10 }
  0x22   : > { %p947_p1 = pnand %p946_p12, %p940_p5 }
  0x24   : > { %950 = shalt.err (!%p947_p1)
}
  0x25   : > { %s951_s5 = scalar_lea.vmem %s1195_s9, 768  ;;  %s1084_s6 = smov [#allocation2]  }
  0x26   : > { %p952_p2 = scmp.ne.s32.totalorder %s1195_s9, %s951_s5  ;;  %s956_s8 = sshll.u32 %s1084_s6, 4  ;;  %s957_s8 = int_to_ptr.vmem [resolvable:$false] %s956_s8 }
  0x27   : > { %s958_s18 = scalar_lea.vmem %s957_s8, 1536  ;;  %p959_p9 = scmp.lt.s32.totalorder %s1195_s9, %s957_s8 }
  0x28   : > { %p954_p4 = pnand %p952_p2, %p938_p3  ;;  %p960_p6 = scmp.lt.s32.totalorder %s958_s18, %s951_s5 }
  0x2a   : > { %p955_p11 = pneg %p954_p4  ;;  %p961_p7 = por %p960_p6, %p959_p9 }
  0x2c   : > { %p962_p10 = pnand %p961_p7, %p955_p11 }
  0x2e   : > { %965 = shalt.err (!%p962_p10)
}
  0x2f   : > { %s1085_s11 = smov 128   ;;  %s1086_s19 = smov 8  }
  0x30   : > { %850 = dma.hbm_to_vmem [thread:$0]  (!%p1182_p0), %s1191_s7, 768, %s1195_s9, %s161_s10, %s1085_s11, %s1085_s11, %s1086_s19  }
  0x31   : > { %p212_p9 = scmp.lt.s32.totalorder %s1082_s17, 3  ;;  %s1235_s23 = scalar_lea.hbm %s1371_s1, %s790_s30 }
  0x32   : > { %p1381_p11 = scmp.ge.s32.totalorder %s1082_s17, 1  ;;  %s188_s6 = scalar_lea.vmem [#allocation5], %s838_s29 }
  0x33   : > { %s196_s8 = sshll.u32 %s188_s6, 4  ;;  %s185_s7 = scalar_lea.sflag [#allocation6], %s1176_s28  ;;  %s1245_s8 = int_to_ptr.vmem [resolvable:$true] %s196_s8 }
  0x34   : > { %p1239_p12 = pnand %p1381_p11, %p212_p9  ;;  %s966_s9 = scalar_lea.hbm %s1235_s23, 768 }
  0x35   : > { %p967_p1 = scmp.ne.s32.totalorder %s1235_s23, %s966_s9  ;;  %s971_s18 = scalar_lea.hbm %s1371_s1, 1536 }
  0x36   : > { %p972_p2 = scmp.lt.u32.totalorder %s1235_s23, %s1371_s1  ;;  %p973_p4 = scmp.lt.u32.totalorder %s971_s18, %s966_s9 }
  0x37   : > { %p969_p5 = pnand %p967_p1, %p938_p3  ;;  %p975_p7 = scmp.lt.u32.totalorder %s966_s9, %s1235_s23 }
  0x38   : > { %p974_p6 = por %p973_p4, %p972_p2 }
  0x39   : > { %p970_p13 = pneg %p969_p5 }
  0x3a   : > { %p976_p10 = por %p975_p7, %p974_p6 }
  0x3c   : > { %p977_p9 = pnand %p976_p10, %p970_p13 }
  0x3e   : > { %980 = shalt.err (!%p977_p9)
}
  0x3f   : > { %s981_s29 = scalar_lea.vmem %s1245_s8, 768  ;;  %s1087_s6 = smov [#allocation5]  }
  0x40   : > { %p982_p11 = scmp.ne.s32.totalorder %s1245_s8, %s981_s29  ;;  %s986_s30 = sshll.u32 %s1087_s6, 4  ;;  %s987_s30 = int_to_ptr.vmem [resolvable:$false] %s986_s30 }
  0x41   : > { %s988_s10 = scalar_lea.vmem %s987_s30, 1536  ;;  %p989_p8 = scmp.lt.s32.totalorder %s1245_s8, %s987_s30 }
  0x42   : > { %p984_p1 = pnand %p982_p11, %p938_p3  ;;  %p990_p2 = scmp.lt.s32.totalorder %s988_s10, %s981_s29 }
  0x44   : > { %p985_p5 = pneg %p984_p1  ;;  %p991_p4 = por %p990_p2, %p989_p8 }
  0x46   : > { %p992_p6 = pnand %p991_p4, %p985_p5 }
  0x48   : > { %995 = shalt.err (!%p992_p6)
}
  0x49   : > { %853 = dma.hbm_to_vmem [thread:$0]  (!%p1182_p0), %s1235_s23, 768, %s1245_s8, %s185_s7, %s1085_s11, %s1085_s11, %s1086_s19  }
  0x4a   : > { %216 = sbr.rel (%p1239_p12) target bundleno = 353 (0x161), region = 32  ;;  %s1279_s9 = sand.u32 (!%p1239_p12), 1, %s1066_s13  }
  0x4b   : > { %s1282_s18 = smul.u32 (!%p1239_p12), 48, %s1279_s9  ;;  %s219_s4 = scalar_lea.sflag (!%p1239_p12), [#allocation3], %s1279_s9 }
  0x4c   : > { %p1383_p8 = scmp.ne.s32.totalorder (!%p1239_p12), %s1377_s24, 0 }
  0x4d   : > { %s1286_s21 = scalar_lea.vmem (!%p1239_p12), [#allocation2], %s1282_s18 }
  0x51   : > { %1049 = dma.done.wait (%p1383_p8), %s219_s4, 768  }
  0x52   : > { %1051 = vsyncadd (%p1383_p8), %s219_s4, 4294966528  ;;  %s228_s28 = scalar_lea.sflag [#allocation6], %s1279_s9  ;;  %s231_s11 = scalar_lea.vmem [#allocation5], %s1282_s18 }
  0x53   : > { %1053 = dma.done.wait (%p1383_p8), %s228_s28, 768  }
  0x54   : > { %1055 = vsyncadd (%p1383_p8), %s228_s28, 4294966528  ;;  %vm284_vm0 = vcmask 130048   ;;  %v275_v0 = vld [vmem:[%s231_s11] sm:$0xff]  ;;  %v276_v1 = vld [vmem:[%s231_s11 + $0x8] sm:$0xff]  ;;  %s266_s24 = smul.u32 3, %s1074_s15  ;;  %s262_s8 = scalar_lea.vmem [#allocation7], %s1282_s18 }
  0x55   : > { %v758_v2 = vld [vmem:[%s231_s11 + $0x10] sm:$0xff]  ;;  %v826_v3 = vpack.c.bf16 %v276_v1, %v275_v0  ;;  %v759_v4 = vld [vmem:[%s231_s11 + $0x18] sm:$0xff]  ;;  %v273_v5 = vld [vmem:[%s1286_s21] sm:$0xff]  ;;  %s623_s7 = sshll.u32 %s262_s8, 4  ;;  %s792_s22 = smul.u32 768, %s1074_s15  ;;  %s1316_s7 = int_to_ptr.vmem [resolvable:$true] %s623_s7 }
  0x56   : > { %v756_v6 = vld [vmem:[%s1286_s21 + $0x10] sm:$0xff]  ;;  %v830_v7 = vpack.c.bf16 %v759_v4, %v758_v2  ;;  %809 = vmatprep.mubr.msk.f32.mxu0 %vm284_vm0, %v273_v5  ;;  %v770_v8 = vld [vmem:[%s231_s11 + $0x20] sm:$0xff]  ;;  %v771_v9 = vld [vmem:[%s231_s11 + $0x28] sm:$0xff]  ;;  %p267_p0 = scmp.lt.s32.totalorder %s266_s24, 5  ;;  %s607_s30 = scalar_lea.sflag [#allocation4], %s1279_s9 }
  0x57   : > { %816 = vmatprep.mubr.msk.f32.mxu1 %vm284_vm0, %v756_v6  ;;  %827 = vmatprep.subr.bf16.mxu0 %v826_v3  ;;  %v274_v10 = vld [vmem:[%s1286_s21 + $0x8] sm:$0xff]  ;;  %v834_v11 = vpack.c.bf16 %v771_v9, %v770_v8  ;;  %v757_v12 = vld [vmem:[%s1286_s21 + $0x18] sm:$0xff]  ;;  %v768_v13 = vld [vmem:[%s1286_s21 + $0x20] sm:$0xff]  ;;  %s1321_s6 = scalar_lea.hbm %s1373_s3, %s792_s22  ;;  %s996_s10 = scalar_lea.vmem %s1316_s7, 768 }
  0x58   : > { %831 = vmatprep.subr.bf16.mxu1 %v830_v7  ;;  %829 = vmatpush3.bf16.msra.mxu0 %v826_v3  ;;  %v769_v14 = vld [vmem:[%s1286_s21 + $0x28] sm:$0xff]  ;;  %s1395_s24 = smov (!%p267_p0, %s266_s24), 5  ;;  %p997_p3 = scmp.ne.s32.totalorder %s1316_s7, %s996_s10 }
  0x59   : > { %833 = vmatpush3.bf16.msra.mxu1 %v830_v7  ;;  %835 = vmatprep.subr.bf16.mxu0 %v834_v11  ;;  %s269_s5 = scalar_lea.vmem %s1372_s2, %s1395_s24  ;;  %p1384_p12 = scmp.ne.s32.totalorder %s1378_s25, 0 }
  0x5a   : > { %v751_v15 = vld [vmem:[%s269_s5] ss:$0 sm:$0xff]  ;;  %v761_v16 = vld [vmem:[%s269_s5 + $0x1] ss:$0 sm:$0xff]  ;;  %v773_v24 = vld [vmem:[%s269_s5 + $0x2] ss:$0 sm:$0xff] }
  0x5b   : > { %810 = vmatmul.mubr.msk.f32.vlgmr.msra.gmra.mrb[0].mxu0 %vm284_vm0, %v274_v10  ;;  %p998_p13 = pnand %p997_p3, %p1384_p12  ;;  %s1088_s18 = smov [#allocation7]  }
  0x5c   : > { %817 = vmatmul.mubr.msk.f32.vlgmr.msra.gmra.mrb[0].mxu1 %vm284_vm0, %v757_v12  ;;  %837 = vmatpush3.bf16.msra.mxu0 %v834_v11  ;;  %s1000_s4 = sshll.u32 %s1088_s18, 4  ;;  %s1001_s4 = int_to_ptr.vmem [resolvable:$false] %s1000_s4 }
  0x5d   : > { %823 = vmatprep.mubr.msk.f32.mxu0 %vm284_vm0, %v768_v13  ;;  %p999_p7 = pneg %p998_p13  ;;  %s1002_s21 = scalar_lea.vmem %s1001_s4, 1536 }
  0x5e   : > { %p1003_p10 = scmp.lt.s32.totalorder %s1316_s7, %s1001_s4  ;;  %p1004_p9 = scmp.lt.s32.totalorder %s1002_s21, %s996_s10 }
  0x5f   : > { %824 = vmatmul.mubr.msk.f32.vlgmr.msra.gmra.mrb[2].mxu0 %vm284_vm0, %v769_v14 }
  0x60   : > { %p1005_p11 = por %p1004_p9, %p1003_p10 }
  0x62   : > { %p1006_p1 = pnand %p1005_p11, %p999_p7 }
 0x12e   : > { %v811_v17 = vpop.f32.mrb[0].mxu0 }
 0x12f   : > { %v363_v18 = vadd.f32 %v811_v17, %v751_v15  ;;  %v818_v19 = vpop.f32.mrb[0].mxu1  ;;  %v357_v20 = vpop.f32.mrb[1].mxu0 }
 0x130   : > { %v474_v21 = vadd.f32 %v818_v19, %v761_v16  ;;  %v358_v22 = vadd.f32 %v751_v15, %v357_v20  ;;  %v468_v23 = vpop.f32.mrb[1].mxu1 }
 0x131   : > { %v755_v25 = vmul.f32 -1.442695, %v363_v18  ;;  %v469_v26 = vadd.f32 %v761_v16, %v468_v23 }
 0x132   : > { %v765_v27 = vmul.f32 -1.442695, %v474_v21  ;;  %v754_v28 = vmul.f32 -1.442695, %v358_v22  ;;  %v825_v29 = vpop.f32.mrb[2].mxu0 }
 0x133   : > { %912 = vpow2.f32 %v755_v25  ;;  %v764_v30 = vmul.f32 -1.442695, %v469_v26  ;;  %v586_v31 = vadd.f32 %v825_v29, %v773_v24  ;;  %v580_v32 = vpop.f32.mrb[3].mxu0 }
 0x134   : > { %914 = vpow2.f32 %v765_v27  ;;  %v581_v33 = vadd.f32 %v773_v24, %v580_v32 }
 0x135   : > { %916 = vpow2.f32 %v754_v28  ;;  %v777_v34 = vmul.f32 -1.442695, %v586_v31 }
 0x136   : > { %918 = vpow2.f32 %v764_v30  ;;  %v776_v35 = vmul.f32 -1.442695, %v581_v33 }
 0x137   : > { %920 = vpow2.f32 %v777_v34 }
 0x138   : > { %922 = vpow2.f32 %v776_v35 }
 0x13d   : > { %v913_v36 = vpop.eup %912 }
 0x13e   : > { %v915_v37 = vpop.eup %914  ;;  %v373_v38 = vadd.f32 1.0, %v913_v36 }
 0x13f   : > { %v917_v39 = vpop.eup %916  ;;  %v484_v40 = vadd.f32 1.0, %v915_v37 }
 0x140   : > { %v919_v41 = vpop.eup %918  ;;  %924 = vrcp.f32 %v373_v38  ;;  %v372_v42 = vadd.f32 1.0, %v917_v39 }
 0x141   : > { %v921_v43 = vpop.eup %920  ;;  %926 = vrcp.f32 %v484_v40  ;;  %v483_v44 = vadd.f32 1.0, %v919_v41 }
 0x142   : > { %v923_v45 = vpop.eup %922  ;;  %928 = vrcp.f32 %v372_v42  ;;  %v596_v46 = vadd.f32 1.0, %v921_v43 }
 0x143   : > { %930 = vrcp.f32 %v483_v44  ;;  %v595_v47 = vadd.f32 1.0, %v923_v45 }
 0x144   : > { %932 = vrcp.f32 %v596_v46 }
 0x145   : > { %934 = vrcp.f32 %v595_v47 }
 0x14a   : > { %v925_v48 = vpop.eup %924 }
 0x14b   : > { %v927_v49 = vpop.eup %926  ;;  %v379_v50 = vmul.f32 %v925_v48, %v363_v18 }
 0x14c   : > { %v929_v51 = vpop.eup %928  ;;  %v490_v52 = vmul.f32 %v927_v49, %v474_v21 }
 0x14d   : > { %v931_v53 = vpop.eup %930  ;;  %381 = vst [vmem:[%s262_s8 + $0x8] sm:$0xff] %v379_v50  ;;  %v378_v54 = vmul.f32 %v929_v51, %v358_v22 }
 0x14e   : > { %v933_v55 = vpop.eup %932  ;;  %767 = vst [vmem:[%s262_s8 + $0x18] sm:$0xff] %v490_v52  ;;  %v489_v56 = vmul.f32 %v931_v53, %v469_v26 }
 0x14f   : > { %v935_v57 = vpop.eup %934  ;;  %380 = vst [vmem:[%s262_s8] sm:$0xff] %v378_v54  ;;  %v602_v58 = vmul.f32 %v933_v55, %v586_v31 }
 0x150   : > { %766 = vst [vmem:[%s262_s8 + $0x10] sm:$0xff] %v489_v56  ;;  %v601_v59 = vmul.f32 %v935_v57, %v581_v33 }
 0x151   : > { %779 = vst [vmem:[%s262_s8 + $0x28] sm:$0xff] %v602_v58 }
 0x152   : > { %778 = vst [vmem:[%s262_s8 + $0x20] sm:$0xff] %v601_v59 }
 0x153   : > { %1009 = shalt.err (!%p1006_p1)
}
 0x154   : > { %s1010_s28 = scalar_lea.hbm %s1321_s6, 768  ;;  %s1014_s19 = scalar_lea.hbm %s1373_s3, 1536 }
 0x155   : > { %p1011_p5 = scmp.ne.s32.totalorder %s1321_s6, %s1010_s28  ;;  %p1015_p6 = scmp.lt.u32.totalorder %s1321_s6, %s1373_s3 }
 0x156   : > { %p1016_p8 = scmp.lt.u32.totalorder %s1014_s19, %s1010_s28  ;;  %p1018_p3 = scmp.lt.u32.totalorder %s1010_s28, %s1321_s6 }
 0x157   : > { %p1012_p2 = pnand %p1011_p5, %p1384_p12 }
 0x158   : > { %p1017_p0 = por %p1016_p8, %p1015_p6 }
 0x159   : > { %p1013_p4 = pneg %p1012_p2 }
 0x15a   : > { %p1019_p13 = por %p1018_p3, %p1017_p0 }
 0x15c   : > { %p1020_p7 = pnand %p1019_p13, %p1013_p4 }
 0x15e   : > { %1023 = shalt.err (!%p1020_p7)
}
 0x15f   : > { %s1089_s8 = smov 128   ;;  %s1090_s22 = smov 8  }
 0x160   : > { %845 = dma.vmem_to_hbm [thread:$0]  (%p1384_p12), %s1316_s7, 768, %s1321_s6, %s607_s30, %s1089_s8, %s1089_s8, %s1090_s22  }
 0x161 PF: > { %s638_s29 = sand.u32 1, %s1062_s12   ;;  %p1385_p10 = scmp.ne.s32.totalorder %s1379_s27, 0 }
 0x162   : > { %p1386_p9 = scmp.ge.s32.totalorder %s1082_s17, 2  ;;  %s639_s15 = scalar_lea.sflag [#allocation4], %s638_s29 }
 0x164   : > { %p855_p11 = pnand %p1386_p9, %p1385_p10 }
 0x166   : > { %1057 = dma.done.wait (!%p855_p11), %s639_s15, 768  }
 0x167   : > { %1059 = vsyncadd (!%p855_p11), %s639_s15, 4294966528  ;;  %s22_s17 = sadd.s32 1, %s1082_s17   ;;  %s1387_s12 = smov %s1066_s13 }
 0x168   : > { %p19_p1 = scmp.ge.s32.totalorder %s22_s17, 4   ;;  %s1388_s13 = smov %s1070_s14 }
 0x169   : > { %s1389_s14 = smov %s1167_s26  ;;  %s1390_s15 = smov %s1078_s16 }
 0x16a   : > { %s1391_s16 = smov %s1393_s20  ;;  %21 = sbr.rel (!%p19_p1) target bundleno = 8 (0x8), region = 101 }
 0x171   :  { %644 = vsyncpa [#allocation3], 1 }
 0x172   :  { %646 = vsyncpa [#allocation3 + $0x1], 1 }
 0x173   :  { %647 = vsyncpa [#allocation6], 1 }
 0x174   :  { %649 = vsyncpa [#allocation6 + $0x1], 1 }
 0x175   :  { %650 = vsyncpa [#allocation4], 1 }
 0x176   :  { %652 = vsyncpa [#allocation4 + $0x1], 1 }

</bundles_post_ra>
